<compile_context>
chip_gen: v6e
topology: v6e:2x2x1
jax: 0.10.0
libtpu: 0.0.40
codegen_flags: <defaults>
</compile_context>

<pallas_src>
import jax
import jax.numpy as jnp
from jax.experimental import pallas as pl
from jax.experimental.pallas import tpu as pltpu


def _copy_kernel(x_ref, o_ref):
    # Both refs are (TM, TL) VMEM tiles over the kept (un-chomped) region, so
    # this is a straight lane-dense copy; masking happens only on the final
    # partial tile at the array edge (handled by Pallas).
    o_ref[...] = x_ref[...]


def _round_up(x: int, m: int) -> int:
    return ((x + m - 1) // m) * m


def _sublane_multiple(dtype) -> int:
    # Sub-32-bit dtypes pack along sublanes: 8 rows for 4-byte, 16 for 2-byte,
    # 32 for 1-byte dtypes.
    itemsize = jnp.dtype(dtype).itemsize
    return max(8, 32 // max(1, itemsize))


def chomp1d(x: jax.Array, chomp_size: int) -> jax.Array:
    """Pallas equivalent of Chomp1d.forward. x: (N, C, L) -> (N, C, L - chomp)."""
    assert x.ndim == 3, "expected (N, C, L)"
    n, c, l = x.shape
    # PyTorch's x[:, :, :-0] is a degenerate empty slice; require a real chomp
    # (the normal TCN usage: chomp_size = (kernel_size - 1) * dilation > 0).
    assert 0 < chomp_size < l, "chomp_size must be in (0, L)"
    out_len = l - chomp_size

    # Flatten (N, C) -> rows. Free reshape: NCL is row-major contiguous in L.
    rows = n * c
    x2d = x.reshape(rows, l)

    sub = _sublane_multiple(x.dtype)
    # Row tile: multiple of the sublane packing factor; capped so the
    # double-buffered (in + out) block footprint stays ~4 MiB max for f32
    # (256 * 1024 * 4 B * 2 bufs * 2 arrays), well under every generation's
    # scoped-VMEM default — no vmem_limit_bytes override needed.
    tm = min(_round_up(rows, sub), 256)
    # Time tile: multiple of 128 lanes over the kept region only.
    tl = min(_round_up(out_len, 128), 1024)

    rows_grid = pl.cdiv(rows, tm)
    time_grid = pl.cdiv(out_len, tl)

    # Same index_map for input and output: time block j covers columns
    # [j*tl, (j+1)*tl) of both the (rows, L) input and the (rows, out_len)
    # output, so the chomped tail is never read and never written.
    index_map = lambda i, j: (i, j)

    # A pure copy at small block sizes is DMA-latency-bound; request a deeper
    # pipeline only when the grid is long enough to benefit.
    block_bytes = tm * tl * jnp.dtype(x.dtype).itemsize
    deep = (rows_grid * time_grid >= 4) and (block_bytes <= 256 * 1024)
    bs_kwargs = {"pipeline_mode": pl.Buffered(3)} if deep else {}

    out2d = pl.pallas_call(
        _copy_kernel,
        out_shape=jax.ShapeDtypeStruct((rows, out_len), x.dtype),
        grid=(rows_grid, time_grid),
        in_specs=[pl.BlockSpec((tm, tl), index_map, **bs_kwargs)],
        out_specs=pl.BlockSpec((tm, tl), index_map, **bs_kwargs),
        compiler_params=pltpu.CompilerParams(
            # Independent copy tiles -> shard across both v7x TensorCores.
            dimension_semantics=("parallel", "parallel"),
        ),
    )(x2d)

    return out2d.reshape(n, c, out_len)


if __name__ == "__main__":
    # Small shapes consistent with a TCN: batch=2, channels=4, seq length=16.
    key = jax.random.PRNGKey(0)
    N, C, L = 2, 4, 16
    chomp_size = 3  # e.g. (kernel_size - 1) * dilation for a causal conv
    x = jax.random.normal(key, (N, C, L), dtype=jnp.float32)

    out = chomp1d(x, chomp_size)
    out = jax.block_until_ready(out)

    # Reference check against plain JAX slicing (same as torch x[:, :, :-chomp]).
    ref = x[:, :, :-chomp_size]
    assert out.shape == (N, C, L - chomp_size)
    assert jnp.array_equal(out, ref)

    print("KERNEL_OK")
</pallas_src>

<mosaic_0001>
module attributes {stable_mosaic.version = 11 : i64} {
  func.func @_copy_kernel(%arg0: i32, %arg1: i32, %arg2: memref<8x128xf32, #tpu.memory_space<vmem>>, %arg3: memref<8x128xf32, #tpu.memory_space<vmem>>) attributes {dimension_semantics = [#tpu.dimension_semantics<parallel>, #tpu.dimension_semantics<parallel>], iteration_bounds = array<i64: 1, 1>, scalar_prefetch = 0 : i64, scratch_operands = 0 : i64, tpu.core_type = #tpu.core_type<tc>, window_params = [{transform_indices = @transform_0, window_bounds = array<i64: 8, 128>}, {transform_indices = @transform_1, window_bounds = array<i64: 8, 128>}]} {
    %c0 = arith.constant 0 : index
    %c0_0 = arith.constant 0 : index
    %0 = vector.load %arg2[%c0, %c0_0] : memref<8x128xf32, #tpu.memory_space<vmem>>, vector<8x128xf32>
    %c0_1 = arith.constant 0 : index
    %c0_2 = arith.constant 0 : index
    %1 = vector.load %arg3[%c0_1, %c0_2] : memref<8x128xf32, #tpu.memory_space<vmem>>, vector<8x128xf32>
    tpu.vector_store %arg3[%c0_1, %c0_2], %0 {strides = array<i32>} : memref<8x128xf32, #tpu.memory_space<vmem>>, vector<8x128xf32>,
    return
  }
  func.func @transform_0(%arg0: i32, %arg1: i32) -> (i32, i32) {
    %c0_i32 = arith.constant 0 : i32
    return %arg0, %arg1 : i32, i32
  }
  func.func @transform_1(%arg0: i32, %arg1: i32) -> (i32, i32) {
    %c0_i32 = arith.constant 0 : i32
    return %arg0, %arg1 : i32, i32
  }
}

</mosaic_0001>

<bundles_post_ra>
// kernel: tpu_custom_call.1
= control target key start
LH: loop header
LB: loop body
LE: loop exit
PB: predicated region body
PF: predicated region fallthrough
CT: control target
= control target key end

     0   :  { %6 = vsyncpa [#allocation3], 0  ;;  %s102_s0 = inlined_call_operand.hbm [shape: f32[8,16], index: 0, kind: input, shape index: {}]   ;;  %s103_s1 = inlined_call_operand.hbm [shape: f32[8,13], index: 1, kind: output, shape index: {}]  }
   0x1   :  { %7 = vsyncpa [#allocation4], 0  ;;  %s84_s6 = smov [#allocation2]  }
   0x2   :  { %s14_s7 = sshll.u32 %s84_s6, 4  ;;  %s15_s7 = int_to_ptr.vmem [resolvable:$true] %s14_s7 }
   0x3   :  { %s48_s8 = scalar_lea.vmem %s15_s7, 128  ;;  %p53_p1 = scmp.lt.s32.totalorder %s15_s7, %s15_s7 }
   0x4   :  { %p49_p0 = scmp.ne.s32.totalorder %s15_s7, %s48_s8  ;;  %p54_p2 = scmp.lt.s32.totalorder %s48_s8, %s48_s8 }
   0x6   :  { %p55_p3 = por %p54_p2, %p53_p1 }
   0x8   :  { %p56_p4 = pnand %p55_p3, %p49_p0 }
   0xa   :  { %59 = shalt.err (!%p56_p4)
}
   0xb   :  { %17 = dma.hbm_to_vmem [thread:$0]  %s102_s0, 128, %s15_s7, [#allocation3]  }
   0xc   :  { %80 = dma.done.wait [#allocation3], 128  }
   0xd   :  { %81 = vsyncadd [#allocation3], 4294967168  ;;  %s85_s11 = smov [#allocation5]   ;;  %v21_v0 = vld [vmem:[#allocation2] sm:$0xff] }
   0xe   :  { %s29_s12 = sshll.u32 %s85_s11, 4  ;;  %22 = vst [vmem:[#allocation5] sm:$0xff] %v21_v0  ;;  %s30_s12 = int_to_ptr.vmem [resolvable:$true] %s29_s12 }
   0xf   :  { %s60_s13 = scalar_lea.vmem %s30_s12, 128  ;;  %p65_p6 = scmp.lt.s32.totalorder %s30_s12, %s30_s12 }
  0x10   :  { %p61_p5 = scmp.ne.s32.totalorder %s30_s12, %s60_s13  ;;  %p66_p7 = scmp.lt.s32.totalorder %s60_s13, %s60_s13 }
  0x12   :  { %p67_p8 = por %p66_p7, %p65_p6 }
  0x14   :  { %p68_p9 = pnand %p67_p8, %p61_p5 }
  0x16   :  { %71 = shalt.err (!%p68_p9)
}
  0x17   :  { %32 = dma.vmem_to_hbm [thread:$0]  %s30_s12, 128, %s103_s1, [#allocation4]  }
  0x18   :  { %82 = dma.done.wait [#allocation4], 128  }
  0x19   :  { %83 = vsyncadd [#allocation4], 4294967168 }
  0x1a   :  { %36 = vsyncpa [#allocation3], 1 }
  0x1b   :  { %37 = vsyncpa [#allocation4], 1 }

</bundles_post_ra>
